<compile_context>
chip_gen: v5e
topology: v5e:2x2
jax: 0.10.0
libtpu: 0.0.40
codegen_flags: <defaults>
</compile_context>

<pallas_src>
import functools

import jax
import jax.numpy as jnp
from jax.experimental import pallas as pl
from jax.experimental.pallas import tpu as pltpu


def _round_up(n: int, m: int) -> int:
    return ((n + m - 1) // m) * m


def _mlp_kernel(*refs, out_dims):
    # refs = (x_ref, w_0, ..., w_{L-1}, bias_slab_ref, o_ref)
    x_ref = refs[0]
    o_ref = refs[-1]
    b_ref = refs[-2]
    w_refs = refs[1:-2]
    num_layers = len(w_refs)

    h = x_ref[...]                                       # [B, Din] f32
    for i, w_ref in enumerate(w_refs):
        dout = out_dims[i]
        # bf16 weights in HBM/VMEM -> upcast once; compute stays f32
        # (f32 VPU path for bias/ReLU, f32 accumulate on the MXU).
        w = w_ref[...].astype(jnp.float32)               # [Din_i, dout]
        b = b_ref[i:i + 1, :dout]                        # [1, dout] static slice
        h = jnp.dot(h, w, preferred_element_type=jnp.float32) + b
        if i < num_layers - 1:                           # hidden layers: ReLU
            h = jnp.maximum(h, 0.0)
    o_ref[...] = h.astype(o_ref.dtype)                   # lane-dense [B, 128] store


def _fused_mlp(x2d, weights, bias_slab, *, out_dims):
    """One gridless pallas_call running the whole MLP out of VMEM."""
    B = x2d.shape[0]
    dout_last = out_dims[-1]
    n_in = 1 + len(weights) + 1

    flops = 2 * B * sum(int(w.shape[0]) * int(w.shape[1]) for w in weights)
    bytes_accessed = (
        x2d.size * x2d.dtype.itemsize
        + sum(w.size * w.dtype.itemsize for w in weights)
        + bias_slab.size * bias_slab.dtype.itemsize
        + B * dout_last * 4
    )

    return pl.pallas_call(
        functools.partial(_mlp_kernel, out_dims=out_dims),
        out_shape=jax.ShapeDtypeStruct((B, dout_last), jnp.float32),
        # Single program, everything resident in VMEM: no grid, no pipelining.
        in_specs=[pl.BlockSpec(memory_space=pltpu.MemorySpace.VMEM)] * n_in,
        out_specs=pl.BlockSpec(memory_space=pltpu.MemorySpace.VMEM),
        cost_estimate=pl.CostEstimate(
            flops=flops, transcendentals=0, bytes_accessed=bytes_accessed),
    )(x2d, *weights, bias_slab)


def init_mlp_params(key, input_size, hidden_sizes, num_classes):
    """PyTorch-style uniform(+-1/sqrt(fan_in)) init. W stored as [in, out]."""
    params = []
    sizes = [input_size] + list(hidden_sizes) + [num_classes]
    for fan_in, fan_out in zip(sizes[:-1], sizes[1:]):
        key, kw, kb = jax.random.split(key, 3)
        bound = 1.0 / jnp.sqrt(jnp.float32(fan_in))
        w = jax.random.uniform(kw, (fan_in, fan_out), jnp.float32, -bound, bound)
        b = jax.random.uniform(kb, (1, fan_out), jnp.float32, -bound, bound)
        params.append((w, b))
    return params


def prepare_params(params):
    """Kernel-side parameter packing (done once, outside the forward jit):
      * weights -> bf16, at their NATURAL (unpadded) shapes; only the last
        layer's output dim is zero-padded to a multiple of 128 so the kernel
        store is unmasked (zero columns stay exactly zero -> sliced off).
      * biases  -> one stacked [num_layers, 128] f32 slab (single DMA)."""
    num_layers = len(params)
    num_classes = params[-1][0].shape[1]
    last_pad = _round_up(num_classes, 128)
    out_dims = tuple(int(w.shape[1]) for w, _ in params[:-1]) + (last_pad,)
    slab_width = _round_up(max(out_dims), 128)

    weights = []
    bias_slab = jnp.zeros((num_layers, slab_width), jnp.float32)
    for i, (w, b) in enumerate(params):
        dout = w.shape[1]
        if i == num_layers - 1 and last_pad != dout:
            w = jnp.zeros((w.shape[0], last_pad), w.dtype).at[:, :dout].set(w)
        weights.append(w.astype(jnp.bfloat16))
        bias_slab = bias_slab.at[i, :dout].set(b[0])
    return weights, bias_slab, out_dims


def make_mlp_forward(num_classes, out_dims):
    @jax.jit
    def forward(x, weights, bias_slab):
        B = x.shape[0]
        h = jnp.reshape(x, (B, -1))                      # nn.Flatten()
        out = _fused_mlp(h, tuple(weights), bias_slab, out_dims=out_dims)
        return out[:, :num_classes]                      # drop padded lanes only
    return forward


def mlp_reference(x, params):
    """Pure-JAX f32 reference matching the PyTorch module."""
    h = jnp.reshape(x, (x.shape[0], -1))
    for w, b in params[:-1]:
        h = jnp.maximum(h @ w + b, 0.0)
    w, b = params[-1]
    return h @ w + b


if __name__ == "__main__":
    key = jax.random.PRNGKey(0)
    k_x, k_p = jax.random.split(key)

    # Input consistent with an image-style MLP: [B, C, H, W] = [2, 4, 16, 16]
    B, C, H, W = 2, 4, 16, 16
    x = jax.random.normal(k_x, (B, C, H, W), jnp.float32)

    input_size = C * H * W                               # 1024
    hidden_sizes = [32, 32]
    num_classes = 10

    params = init_mlp_params(k_p, input_size, hidden_sizes, num_classes)
    weights, bias_slab, out_dims = prepare_params(params)

    mlp_forward = make_mlp_forward(num_classes, out_dims)
    out = jax.block_until_ready(mlp_forward(x, weights, bias_slab))

    ref = mlp_reference(x, params)
    assert out.shape == (B, num_classes)
    # bf16-shipped weights -> bf16-appropriate tolerance vs the f32 reference.
    assert jnp.allclose(out, ref, atol=3e-2, rtol=3e-2)

    print("KERNEL_OK")
</pallas_src>

<mosaic_0001>
module attributes {stable_mosaic.version = 11 : i64} {
  func.func @_mlp_kernel(%arg0: memref<2x1024xf32, #tpu.memory_space<vmem>>, %arg1: memref<1024x32xbf16, #tpu.memory_space<vmem>>, %arg2: memref<32x32xbf16, #tpu.memory_space<vmem>>, %arg3: memref<32x128xbf16, #tpu.memory_space<vmem>>, %arg4: memref<3x128xf32, #tpu.memory_space<vmem>>, %arg5: memref<2x128xf32, #tpu.memory_space<vmem>>) attributes {dimension_semantics = [], scalar_prefetch = 0 : i64, scratch_operands = 0 : i64, tpu.core_type = #tpu.core_type<tc>} {
    %c0 = arith.constant 0 : index
    %c0_0 = arith.constant 0 : index
    %0 = vector.load %arg0[%c0, %c0_0] : memref<2x1024xf32, #tpu.memory_space<vmem>>, vector<2x1024xf32>
    %c0_1 = arith.constant 0 : index
    %c0_2 = arith.constant 0 : index
    %1 = vector.load %arg1[%c0_1, %c0_2] : memref<1024x32xbf16, #tpu.memory_space<vmem>>, vector<1024x32xbf16>
    %2 = arith.extf %1 : vector<1024x32xbf16> to vector<1024x32xf32>
    %c0_3 = arith.constant 0 : index
    %c0_4 = arith.constant 0 : index
    %3 = vector.load %arg4[%c0_3, %c0_4] : memref<3x128xf32, #tpu.memory_space<vmem>>, vector<1x32xf32>
    %cst = arith.constant dense<0.000000e+00> : vector<2x32xf32>
    %4 = tpu.matmul %0, %2, %cst {dimension_numbers = #tpu.dot_dimension_numbers<[1], [0], [0], [1], [0, 0, 1, 1], [], []>} : vector<2x1024xf32>, vector<1024x32xf32>, vector<2x32xf32> -> vector<2x32xf32>
    %5 = vector.broadcast %3 : vector<1x32xf32> to vector<2x32xf32>
    %6 = arith.addf %4, %5 : vector<2x32xf32>
    %cst_5 = arith.constant 0.000000e+00 : f32
    %7 = vector.broadcast %cst_5 : f32 to vector<2x32xf32>
    %8 = arith.maximumf %6, %7 : vector<2x32xf32>
    %c0_6 = arith.constant 0 : index
    %c0_7 = arith.constant 0 : index
    %9 = vector.load %arg2[%c0_6, %c0_7] : memref<32x32xbf16, #tpu.memory_space<vmem>>, vector<32x32xbf16>
    %10 = arith.extf %9 : vector<32x32xbf16> to vector<32x32xf32>
    %c1 = arith.constant 1 : index
    %c0_8 = arith.constant 0 : index
    %11 = vector.load %arg4[%c1, %c0_8] : memref<3x128xf32, #tpu.memory_space<vmem>>, vector<1x32xf32>
    %cst_9 = arith.constant dense<0.000000e+00> : vector<2x32xf32>
    %12 = tpu.matmul %8, %10, %cst_9 {dimension_numbers = #tpu.dot_dimension_numbers<[1], [0], [0], [1], [0, 0, 1, 1], [], []>} : vector<2x32xf32>, vector<32x32xf32>, vector<2x32xf32> -> vector<2x32xf32>
    %13 = vector.broadcast %11 : vector<1x32xf32> to vector<2x32xf32>
    %14 = arith.addf %12, %13 : vector<2x32xf32>
    %cst_10 = arith.constant 0.000000e+00 : f32
    %15 = vector.broadcast %cst_10 : f32 to vector<2x32xf32>
    %16 = arith.maximumf %14, %15 : vector<2x32xf32>
    %c0_11 = arith.constant 0 : index
    %c0_12 = arith.constant 0 : index
    %17 = vector.load %arg3[%c0_11, %c0_12] : memref<32x128xbf16, #tpu.memory_space<vmem>>, vector<32x128xbf16>
    %18 = arith.extf %17 : vector<32x128xbf16> to vector<32x128xf32>
    %c2 = arith.constant 2 : index
    %c0_13 = arith.constant 0 : index
    %19 = vector.load %arg4[%c2, %c0_13] : memref<3x128xf32, #tpu.memory_space<vmem>>, vector<1x128xf32>
    %cst_14 = arith.constant dense<0.000000e+00> : vector<2x128xf32>
    %20 = tpu.matmul %16, %18, %cst_14 {dimension_numbers = #tpu.dot_dimension_numbers<[1], [0], [0], [1], [0, 0, 1, 1], [], []>} : vector<2x32xf32>, vector<32x128xf32>, vector<2x128xf32> -> vector<2x128xf32>
    %21 = vector.broadcast %19 : vector<1x128xf32> to vector<2x128xf32>
    %22 = arith.addf %20, %21 : vector<2x128xf32>
    %c0_15 = arith.constant 0 : index
    %c0_16 = arith.constant 0 : index
    %23 = vector.load %arg5[%c0_15, %c0_16] : memref<2x128xf32, #tpu.memory_space<vmem>>, vector<2x128xf32>
    tpu.vector_store %arg5[%c0_15, %c0_16], %22 {strides = array<i32>} : memref<2x128xf32, #tpu.memory_space<vmem>>, vector<2x128xf32>,
    return
  }
}

</mosaic_0001>

<bundles_post_ra>
// kernel: forward.1
= control target key start
LH: loop header
LB: loop body
LE: loop exit
PB: predicated region body
PF: predicated region fallthrough
CT: control target
= control target key end

     0   :  { %s1170_s0 = inlined_call_operand.vmem [shape: f32[2,1024], index: 0, kind: input, shape index: {}]   ;;  %s1171_s1 = inlined_call_operand.vmem [shape: bf16[1024,32], index: 1, kind: input, shape index: {}]   ;;  %s1172_s2 = inlined_call_operand.vmem [shape: bf16[32,32], index: 2, kind: input, shape index: {}]   ;;  %s1173_s3 = inlined_call_operand.vmem [shape: bf16[32,128], index: 3, kind: input, shape index: {}]   ;;  %s1174_s4 = inlined_call_operand.vmem [shape: f32[3,128], index: 4, kind: input, shape index: {}]   ;;  %s1175_s5 = inlined_call_operand.hbm [shape: f32[2,128], index: 5, kind: output, shape index: {}]  }
   0x1   :  { %v844_v0 = vld [vmem:[%s1171_s1 + $0xb8] sm:$0xff]   ;;  %v843_v8 = vld [vmem:[%s1171_s1 + $0xb0] sm:$0xff]   ;;  %v842_v20 = vld [vmem:[%s1171_s1 + $0xa8] sm:$0xff]  }
   0x2   :  { %v828_v1 = vld [vmem:[%s1171_s1 + $0x38] sm:$0xff]   ;;  %v645_v3 = vunpack.c.h.bf16 %v844_v0  ;;  %v644_v5 = vunpack.c.l.bf16 %v844_v0  ;;  %v827_v9 = vld [vmem:[%s1171_s1 + $0x30] sm:$0xff]   ;;  %v641_v15 = vunpack.c.h.bf16 %v843_v8  ;;  %v826_v21 = vld [vmem:[%s1171_s1 + $0x28] sm:$0xff]   ;;  %v640_v22 = vunpack.c.l.bf16 %v843_v8 }
   0x3   :  { %v852_v2 = vld [vmem:[%s1171_s1 + $0xf8] sm:$0xff]   ;;  %v581_v4 = vunpack.c.h.bf16 %v828_v1  ;;  %v580_v10 = vunpack.c.l.bf16 %v828_v1  ;;  %v851_v13 = vld [vmem:[%s1171_s1 + $0xf0] sm:$0xff]   ;;  %v577_v16 = vunpack.c.h.bf16 %v827_v9  ;;  %v576_v23 = vunpack.c.l.bf16 %v827_v9  ;;  %v850_v24 = vld [vmem:[%s1171_s1 + $0xe8] sm:$0xff]  }
   0x4   :  { %v677_v6 = vunpack.c.h.bf16 %v852_v2  ;;  %v836_v7 = vld [vmem:[%s1171_s1 + $0x78] sm:$0xff]   ;;  %v676_v12 = vunpack.c.l.bf16 %v852_v2  ;;  %v835_v14 = vld [vmem:[%s1171_s1 + $0x70] sm:$0xff]   ;;  %342 = vmatpush.msra.mxu2 %v645_v3  ;;  %v673_v18 = vunpack.c.h.bf16 %v851_v13  ;;  %v834_v25 = vld [vmem:[%s1171_s1 + $0x68] sm:$0xff]   ;;  %v672_v26 = vunpack.c.l.bf16 %v851_v13 }
   0x5   :  { %v613_v11 = vunpack.c.h.bf16 %v836_v7  ;;  %302 = vmatpush.msra.mxu0 %v581_v4  ;;  %v612_v17 = vunpack.c.l.bf16 %v836_v7  ;;  %v609_v19 = vunpack.c.h.bf16 %v835_v14  ;;  %v608_v27 = vunpack.c.l.bf16 %v835_v14  ;;  %v841_v32 = vld [vmem:[%s1171_s1 + $0xa0] sm:$0xff]   ;;  %v840_v44 = vld [vmem:[%s1171_s1 + $0x98] sm:$0xff]   ;;  %v839_v54 = vld [vmem:[%s1171_s1 + $0x90] sm:$0xff]  }
   0x6   :  { %362 = vmatpush.msra.mxu3 %v677_v6  ;;  %343 = vmatpush.msra.mxu2 %v644_v5  ;;  %v637_v28 = vunpack.c.h.bf16 %v842_v20  ;;  %v573_v29 = vunpack.c.h.bf16 %v826_v21  ;;  %v669_v30 = vunpack.c.h.bf16 %v850_v24  ;;  %v605_v31 = vunpack.c.h.bf16 %v834_v25  ;;  %v825_v33 = vld [vmem:[%s1171_s1 + $0x20] sm:$0xff]   ;;  %v824_v45 = vld [vmem:[%s1171_s1 + $0x18] sm:$0xff]   ;;  %v823_v57 = vld [vmem:[%s1171_s1 + $0x10] sm:$0xff]  }
   0x7   :  { %322 = vmatpush.msra.mxu1 %v613_v11  ;;  %303 = vmatpush.msra.mxu0 %v580_v10  ;;  %v636_v34 = vunpack.c.l.bf16 %v842_v20  ;;  %v572_v35 = vunpack.c.l.bf16 %v826_v21  ;;  %v849_v36 = vld [vmem:[%s1171_s1 + $0xe0] sm:$0xff]   ;;  %v668_v38 = vunpack.c.l.bf16 %v850_v24  ;;  %v604_v39 = vunpack.c.l.bf16 %v834_v25  ;;  %v848_v48 = vld [vmem:[%s1171_s1 + $0xd8] sm:$0xff]   ;;  %v847_v61 = vld [vmem:[%s1171_s1 + $0xd0] sm:$0xff]  }
   0x8   :  { %363 = vmatpush.msra.mxu3 %v676_v12  ;;  %344 = vmatpush.msra.mxu2 %v641_v15  ;;  %v833_v37 = vld [vmem:[%s1171_s1 + $0x60] sm:$0xff]   ;;  %v633_v40 = vunpack.c.h.bf16 %v841_v32  ;;  %v569_v41 = vunpack.c.h.bf16 %v825_v33  ;;  %v665_v42 = vunpack.c.h.bf16 %v849_v36  ;;  %v632_v46 = vunpack.c.l.bf16 %v841_v32  ;;  %v832_v49 = vld [vmem:[%s1171_s1 + $0x58] sm:$0xff]   ;;  %v831_v62 = vld [vmem:[%s1171_s1 + $0x50] sm:$0xff]  }
   0x9   :  { %323 = vmatpush.msra.mxu1 %v612_v17  ;;  %304 = vmatpush.msra.mxu0 %v577_v16  ;;  %v601_v43 = vunpack.c.h.bf16 %v833_v37  ;;  %v568_v47 = vunpack.c.l.bf16 %v825_v33  ;;  %v664_v50 = vunpack.c.l.bf16 %v849_v36  ;;  %v600_v51 = vunpack.c.l.bf16 %v833_v37  ;;  %v21_v58 = vld [vmem:[%s1170_s0] sm:$0xff] }
   0xa   :  { %364 = vmatpush.msra.mxu3 %v673_v18  ;;  %345 = vmatpush.msra.mxu2 %v640_v22  ;;  %v629_v52 = vunpack.c.h.bf16 %v840_v44  ;;  %v565_v53 = vunpack.c.h.bf16 %v824_v45  ;;  %v661_v55 = vunpack.c.h.bf16 %v848_v48  ;;  %v597_v56 = vunpack.c.h.bf16 %v832_v49  ;;  %283 = vst [vmem:[#allocation1] ss:$4 sm:$0xff] %v21_v58 }
   0xb   :  { %324 = vmatpush.msra.mxu1 %v609_v19  ;;  %305 = vmatpush.msra.mxu0 %v576_v23  ;;  %v628_v59 = vunpack.c.l.bf16 %v840_v44  ;;  %v564_v60 = vunpack.c.l.bf16 %v824_v45  ;;  %v660_v63 = vunpack.c.l.bf16 %v848_v48  ;;  %v596_v0 = vunpack.c.l.bf16 %v832_v49 }
   0xc   :  { %365 = vmatpush.msra.mxu3 %v672_v26  ;;  %346 = vmatpush.msra.mxu2 %v637_v28 }
   0xd   :  { %325 = vmatpush.msra.mxu1 %v608_v27  ;;  %306 = vmatpush.msra.mxu0 %v573_v29 }
   0xe   :  { %366 = vmatpush.msra.mxu3 %v669_v30  ;;  %347 = vmatpush.msra.mxu2 %v636_v34 }
   0xf   :  { %326 = vmatpush.msra.mxu1 %v605_v31  ;;  %307 = vmatpush.msra.mxu0 %v572_v35 }
  0x10   :  { %367 = vmatpush.msra.mxu3 %v668_v38  ;;  %348 = vmatpush.msra.mxu2 %v633_v40 }
  0x11   :  { %327 = vmatpush.msra.mxu1 %v604_v39  ;;  %308 = vmatpush.msra.mxu0 %v569_v41 }
  0x12   :  { %368 = vmatpush.msra.mxu3 %v665_v42  ;;  %349 = vmatpush.msra.mxu2 %v632_v46 }
  0x13   :  { %328 = vmatpush.msra.mxu1 %v601_v43  ;;  %309 = vmatpush.msra.mxu0 %v568_v47 }
  0x14   :  { %369 = vmatpush.msra.mxu3 %v664_v50 }
  0x15   :  { %329 = vmatpush.msra.mxu1 %v600_v51 }
  0x16   :  { %10 = vsyncpa [#allocation3], 0  ;;  %350 = vmatpush.msra.mxu2 %v629_v52  ;;  %310 = vmatpush.msra.mxu0 %v565_v53  ;;  %v625_v1 = vunpack.c.h.bf16 %v839_v54  ;;  %v561_v2 = vunpack.c.h.bf16 %v823_v57  ;;  %v657_v3 = vunpack.c.h.bf16 %v847_v61  ;;  %v593_v4 = vunpack.c.h.bf16 %v831_v62  ;;  %v838_v5 = vld [vmem:[%s1171_s1 + $0x88] sm:$0xff]   ;;  %v837_v17 = vld [vmem:[%s1171_s1 + $0x80] sm:$0xff]   ;;  %s917_s9 = smov [#allocation2]   ;;  %s539_s12 = sshll.u32 %s1175_s5, 4  ;;  %s540_s12 = int_to_ptr.hbm [resolvable:$true] %s539_s12 }
  0x17   :  { %370 = vmatpush.msra.mxu3 %v661_v55  ;;  %330 = vmatpush.msra.mxu1 %v597_v56  ;;  %v822_v6 = vld [vmem:[%s1171_s1 + $0x8] sm:$0xff]   ;;  %v624_v7 = vunpack.c.l.bf16 %v839_v54  ;;  %v560_v8 = vunpack.c.l.bf16 %v823_v57  ;;  %v656_v11 = vunpack.c.l.bf16 %v847_v61  ;;  %v592_v12 = vunpack.c.l.bf16 %v831_v62  ;;  %v551_v18 = vld [vmem:[%s1171_s1] sm:$0xff]   ;;  %v876_v28 = vld [vmem:[%s1171_s1 + $0x1b8] sm:$0xff]   ;;  %s537_s10 = sshll.u32 %s917_s9, 4  ;;  %s538_s10 = int_to_ptr.vmem [resolvable:$true] %s537_s10 }
  0x18   :  { %351 = vmatpush.msra.mxu2 %v628_v59  ;;  %311 = vmatpush.msra.mxu0 %v564_v60  ;;  %v846_v9 = vld [vmem:[%s1171_s1 + $0xc8] sm:$0xff]   ;;  %v621_v13 = vunpack.c.h.bf16 %v838_v5  ;;  %v557_v14 = vunpack.c.h.bf16 %v822_v6  ;;  %v620_v19 = vunpack.c.l.bf16 %v838_v5  ;;  %v556_v20 = vunpack.c.l.bf16 %v822_v6  ;;  %v845_v21 = vld [vmem:[%s1171_s1 + $0xc0] sm:$0xff]   ;;  %v860_v31 = vld [vmem:[%s1171_s1 + $0x138] sm:$0xff]  }
  0x19   :  { %v830_v10 = vld [vmem:[%s1171_s1 + $0x48] sm:$0xff]   ;;  %371 = vmatpush.msra.mxu3 %v660_v63  ;;  %331 = vmatpush.msra.mxu1 %v596_v0  ;;  %v653_v15 = vunpack.c.h.bf16 %v846_v9  ;;  %v829_v22 = vld [vmem:[%s1171_s1 + $0x40] sm:$0xff]   ;;  %v652_v23 = vunpack.c.l.bf16 %v846_v9  ;;  %v617_v26 = vunpack.c.h.bf16 %v837_v17  ;;  %v553_v27 = vunpack.c.h.bf16 %v551_v18  ;;  %v884_v32 = vld [vmem:[%s1171_s1 + $0x1f8] sm:$0xff]  }
  0x1a   :  { %352 = vmatpush.msra.mxu2 %v625_v1  ;;  %312 = vmatpush.msra.mxu0 %v561_v2  ;;  %v589_v16 = vunpack.c.h.bf16 %v830_v10  ;;  %v588_v24 = vunpack.c.l.bf16 %v830_v10  ;;  %v22_v25 = vld [vmem:[%s1170_s0 + $0x8] sm:$0xff]  ;;  %v649_v29 = vunpack.c.h.bf16 %v845_v21  ;;  %v585_v30 = vunpack.c.h.bf16 %v829_v22  ;;  %v868_v37 = vld [vmem:[%s1171_s1 + $0x178] sm:$0xff]   ;;  %v875_v40 = vld [vmem:[%s1171_s1 + $0x1b0] sm:$0xff]  }
  0x1b   :  { %372 = vmatpush.msra.mxu3 %v657_v3  ;;  %332 = vmatpush.msra.mxu1 %v593_v4  ;;  %285 = vst [vmem:[#allocation1 + $0x20] ss:$4 sm:$0xff] %v22_v25  ;;  %v616_v33 = vunpack.c.l.bf16 %v837_v17  ;;  %v552_v34 = vunpack.c.l.bf16 %v551_v18  ;;  %v773_v35 = vunpack.c.h.bf16 %v876_v28  ;;  %v648_v36 = vunpack.c.l.bf16 %v845_v21  ;;  %v859_v43 = vld [vmem:[%s1171_s1 + $0x130] sm:$0xff]   ;;  %v874_v52 = vld [vmem:[%s1171_s1 + $0x1a8] sm:$0xff]   ;;  %v873_v0 = vld [vmem:[%s1171_s1 + $0x1a0] sm:$0xff]  }
  0x1c   :  { %353 = vmatpush.msra.mxu2 %v624_v7  ;;  %313 = vmatpush.msra.mxu0 %v560_v8  ;;  %v709_v38 = vunpack.c.h.bf16 %v860_v31  ;;  %v805_v39 = vunpack.c.h.bf16 %v884_v32  ;;  %v772_v41 = vunpack.c.l.bf16 %v876_v28  ;;  %v584_v42 = vunpack.c.l.bf16 %v829_v22  ;;  %v883_v46 = vld [vmem:[%s1171_s1 + $0x1f0] sm:$0xff]   ;;  %v858_v55 = vld [vmem:[%s1171_s1 + $0x128] sm:$0xff]   ;;  %v857_v3 = vld [vmem:[%s1171_s1 + $0x120] sm:$0xff]  }
  0x1d   :  { %373 = vmatpush.msra.mxu3 %v656_v11  ;;  %333 = vmatpush.msra.mxu1 %v592_v12  ;;  %v708_v44 = vunpack.c.l.bf16 %v860_v31  ;;  %v741_v45 = vunpack.c.h.bf16 %v868_v37  ;;  %v769_v47 = vunpack.c.h.bf16 %v875_v40  ;;  %v804_v48 = vunpack.c.l.bf16 %v884_v32  ;;  %v867_v49 = vld [vmem:[%s1171_s1 + $0x170] sm:$0xff]   ;;  %v882_v58 = vld [vmem:[%s1171_s1 + $0x1e8] sm:$0xff]   ;;  %v881_v6 = vld [vmem:[%s1171_s1 + $0x1e0] sm:$0xff]  }
  0x1e   :  { %354 = vmatpush.msra.mxu2 %v621_v13  ;;  %314 = vmatpush.msra.mxu0 %v557_v14  ;;  %v705_v50 = vunpack.c.h.bf16 %v859_v43  ;;  %v740_v51 = vunpack.c.l.bf16 %v868_v37  ;;  %v768_v53 = vunpack.c.l.bf16 %v875_v40  ;;  %v801_v54 = vunpack.c.h.bf16 %v883_v46  ;;  %v866_v61 = vld [vmem:[%s1171_s1 + $0x168] sm:$0xff]   ;;  %v865_v9 = vld [vmem:[%s1171_s1 + $0x160] sm:$0xff]   ;;  %v872_v12 = vld [vmem:[%s1171_s1 + $0x198] sm:$0xff]  }
  0x1f   :  { %374 = vmatpush.msra.mxu3 %v653_v15  ;;  %334 = vmatpush.msra.mxu1 %v589_v16  ;;  %v704_v56 = vunpack.c.l.bf16 %v859_v43  ;;  %v737_v57 = vunpack.c.h.bf16 %v867_v49  ;;  %v765_v59 = vunpack.c.h.bf16 %v874_v52  ;;  %v800_v60 = vunpack.c.l.bf16 %v883_v46  ;;  %v856_v15 = vld [vmem:[%s1171_s1 + $0x118] sm:$0xff]   ;;  %v854_v40 = vld [vmem:[%s1171_s1 + $0x108] sm:$0xff]   ;;  %v286_v46 = vld.sshfl [vmem:[#allocation1] sm:$0xff pattern:$0x73625140] }
  0x20   :  { %355 = vmatpush.msra.mxu2 %v620_v19  ;;  %315 = vmatpush.msra.mxu0 %v556_v20  ;;  %v701_v62 = vunpack.c.h.bf16 %v858_v55  ;;  %v736_v63 = vunpack.c.l.bf16 %v867_v49  ;;  %v764_v1 = vunpack.c.l.bf16 %v874_v52  ;;  %v797_v2 = vunpack.c.h.bf16 %v882_v58  ;;  %v880_v18 = vld [vmem:[%s1171_s1 + $0x1d8] sm:$0xff]   ;;  %v869_v52 = vld [vmem:[%s1171_s1 + $0x180] sm:$0xff]  }
  0x21   :  { %375 = vmatpush.msra.mxu3 %v652_v23  ;;  %335 = vmatpush.msra.mxu1 %v588_v24  ;;  %v700_v4 = vunpack.c.l.bf16 %v858_v55  ;;  %v733_v5 = vunpack.c.h.bf16 %v866_v61  ;;  %v761_v7 = vunpack.c.h.bf16 %v873_v0  ;;  %v796_v8 = vunpack.c.l.bf16 %v882_v58  ;;  %v864_v21 = vld [vmem:[%s1171_s1 + $0x158] sm:$0xff]   ;;  %v871_v24 = vld [vmem:[%s1171_s1 + $0x190] sm:$0xff]   ;;  %v287_v55 = vld.sshfl [vmem:[#allocation1 + $0x8] sm:$0xff pattern:$0x73625140] }
  0x22   :  { %356 = vmatpush.msra.mxu2 %v617_v26  ;;  %316 = vmatpush.msra.mxu0 %v553_v27  ;;  %v697_v10 = vunpack.c.h.bf16 %v857_v3  ;;  %v732_v11 = vunpack.c.l.bf16 %v866_v61  ;;  %v760_v13 = vunpack.c.l.bf16 %v873_v0  ;;  %v793_v14 = vunpack.c.h.bf16 %v881_v6  ;;  %v855_v27 = vld [vmem:[%s1171_s1 + $0x110] sm:$0xff]   ;;  %v289_v49 = vld.sshfl [vmem:[#allocation1 + $0x18] sm:$0xff pattern:$0x73625140]  ;;  %v877_v58 = vld [vmem:[%s1171_s1 + $0x1c0] sm:$0xff]  }
  0x23   :  { %376 = vmatpush.msra.mxu3 %v649_v29  ;;  %336 = vmatpush.msra.mxu1 %v585_v30  ;;  %v696_v16 = vunpack.c.l.bf16 %v857_v3  ;;  %v729_v17 = vunpack.c.h.bf16 %v865_v9  ;;  %v757_v19 = vunpack.c.h.bf16 %v872_v12  ;;  %v792_v20 = vunpack.c.l.bf16 %v881_v6  ;;  %v879_v30 = vld [vmem:[%s1171_s1 + $0x1d0] sm:$0xff]   ;;  %v290_v6 = vld.sshfl [vmem:[#allocation1 + $0x20] sm:$0xff pattern:$0x73625140] }
  0x24   :  { %357 = vmatpush.msra.mxu2 %v616_v33  ;;  %317 = vmatpush.msra.mxu0 %v552_v34  ;;  %v693_v22 = vunpack.c.h.bf16 %v856_v15  ;;  %v728_v23 = vunpack.c.l.bf16 %v865_v9  ;;  %v756_v25 = vunpack.c.l.bf16 %v872_v12  ;;  %v789_v26 = vunpack.c.h.bf16 %v880_v18  ;;  %v292_v3 = vld.sshfl [vmem:[#allocation1 + $0x30] sm:$0xff pattern:$0x73625140]  ;;  %v291_v9 = vld.sshfl [vmem:[#allocation1 + $0x28] sm:$0xff pattern:$0x73625140] }
  0x25   :  { %377 = vmatpush.msra.mxu3 %v648_v36  ;;  %337 = vmatpush.msra.mxu1 %v584_v42  ;;  %v692_v28 = vunpack.c.l.bf16 %v856_v15  ;;  %v725_v29 = vunpack.c.h.bf16 %v864_v21  ;;  %v753_v31 = vunpack.c.h.bf16 %v871_v24  ;;  %v788_v32 = vunpack.c.l.bf16 %v880_v18  ;;  %v870_v36 = vld [vmem:[%s1171_s1 + $0x188] sm:$0xff]  }
  0x26   :  { %422 = vmatpush.msrb.mxu2 %v773_v35  ;;  %382 = vmatpush.msrb.mxu0 %v709_v38  ;;  %v689_v33 = vunpack.c.h.bf16 %v855_v27  ;;  %v724_v34 = vunpack.c.l.bf16 %v864_v21  ;;  %v863_v35 = vld [vmem:[%s1171_s1 + $0x150] sm:$0xff]   ;;  %v752_v37 = vunpack.c.l.bf16 %v871_v24  ;;  %v785_v38 = vunpack.c.h.bf16 %v879_v30 }
  0x27   :  { %442 = vmatpush.msrb.mxu3 %v805_v39  ;;  %402 = vmatpush.msrb.mxu1 %v741_v45  ;;  %v688_v39 = vunpack.c.l.bf16 %v855_v27  ;;  %v721_v42 = vunpack.c.h.bf16 %v863_v35  ;;  %v749_v43 = vunpack.c.h.bf16 %v870_v36  ;;  %v878_v45 = vld [vmem:[%s1171_s1 + $0x1c8] sm:$0xff]   ;;  %v744_v0 = vunpack.c.l.bf16 %v869_v52 }
  0x28   :  { %423 = vmatpush.msrb.mxu2 %v772_v41  ;;  %383 = vmatpush.msrb.mxu0 %v708_v44  ;;  %v288_v41 = vld.sshfl [vmem:[#allocation1 + $0x10] sm:$0xff pattern:$0x73625140]  ;;  %v784_v44 = vunpack.c.l.bf16 %v879_v30  ;;  %vm473_vm0 = vcmask 261120  }
  0x29   :  { %443 = vmatpush.msrb.mxu3 %v804_v48  ;;  %403 = vmatpush.msrb.mxu1 %v740_v51  ;;  %v862_v48 = vld [vmem:[%s1171_s1 + $0x148] sm:$0xff]   ;;  %v748_v51 = vunpack.c.l.bf16 %v870_v36 }
  0x2a   :  { %424 = vmatpush.msrb.mxu2 %v769_v47  ;;  %384 = vmatpush.msrb.mxu0 %v705_v50  ;;  %v685_v47 = vunpack.c.h.bf16 %v854_v40  ;;  %v720_v50 = vunpack.c.l.bf16 %v863_v35 }
  0x2b   :  { %444 = vmatpush.msrb.mxu3 %v801_v54  ;;  %404 = vmatpush.msrb.mxu1 %v737_v57  ;;  %v853_v54 = vld [vmem:[%s1171_s1 + $0x100] sm:$0xff]   ;;  %v717_v57 = vunpack.c.h.bf16 %v862_v48 }
  0x2c   :  { %425 = vmatpush.msrb.mxu2 %v768_v53  ;;  %385 = vmatpush.msrb.mxu0 %v704_v56  ;;  %v781_v53 = vunpack.c.h.bf16 %v878_v45  ;;  %v684_v56 = vunpack.c.l.bf16 %v854_v40  ;;  %v681_v61 = vunpack.c.h.bf16 %v853_v54  ;;  %v889_v40 = vld [vmem:[%s1174_s4 + $0x1] ss:$0 sm:$0xff] }
  0x2d   :  { %445 = vmatpush.msrb.mxu3 %v800_v60  ;;  %405 = vmatpush.msrb.mxu1 %v736_v63  ;;  %v780_v60 = vunpack.c.l.bf16 %v878_v45  ;;  %v861_v63 = vld [vmem:[%s1171_s1 + $0x140] sm:$0xff]  }
  0x2e   :  { %426 = vmatpush.msrb.mxu2 %v765_v59  ;;  %386 = vmatpush.msrb.mxu0 %v701_v62  ;;  %v745_v59 = vunpack.c.h.bf16 %v869_v52  ;;  %v716_v62 = vunpack.c.l.bf16 %v862_v48 }
  0x2f   :  { %446 = vmatpush.msrb.mxu3 %v797_v2  ;;  %406 = vmatpush.msrb.mxu1 %v733_v5  ;;  %v680_v2 = vunpack.c.l.bf16 %v853_v54  ;;  %v776_v5 = vunpack.c.l.bf16 %v877_v58 }
  0x30   :  { %427 = vmatpush.msrb.mxu2 %v764_v1  ;;  %387 = vmatpush.msrb.mxu0 %v700_v4  ;;  %v777_v1 = vunpack.c.h.bf16 %v877_v58  ;;  %v713_v4 = vunpack.c.h.bf16 %v861_v63 }
  0x31   :  { %447 = vmatpush.msrb.mxu3 %v796_v8  ;;  %407 = vmatpush.msrb.mxu1 %v732_v11  ;;  %v712_v8 = vunpack.c.l.bf16 %v861_v63 }
  0x32   :  { %428 = vmatpush.msrb.mxu2 %v761_v7  ;;  %388 = vmatpush.msrb.mxu0 %v697_v10  ;;  %v293_v7 = vld.sshfl [vmem:[#allocation1 + $0x38] sm:$0xff pattern:$0x73625140]  ;;  %v885_v10 = vld [vmem:[%s1172_s2 + $0x8] sm:$0xff]  }
  0x33   :  { %448 = vmatpush.msrb.mxu3 %v793_v14  ;;  %408 = vmatpush.msrb.mxu1 %v729_v17  ;;  %v813_v11 = vunpack.c.h.bf16 %v885_v10  ;;  %v812_v12 = vunpack.c.l.bf16 %v885_v10 }
  0x34   :  { %429 = vmatpush.msrb.mxu2 %v760_v13  ;;  %389 = vmatpush.msrb.mxu0 %v696_v16  ;;  %v807_v13 = vld [vmem:[%s1172_s2] sm:$0xff]   ;;  %v886_v16 = vld [vmem:[%s1173_s3 + $0x8] sm:$0xff]  }
  0x35   :  { %449 = vmatpush.msrb.mxu3 %v792_v20  ;;  %409 = vmatpush.msrb.mxu1 %v728_v23  ;;  %v809_v14 = vunpack.c.h.bf16 %v807_v13  ;;  %v808_v15 = vunpack.c.l.bf16 %v807_v13  ;;  %v821_v17 = vunpack.c.h.bf16 %v886_v16  ;;  %v820_v18 = vunpack.c.l.bf16 %v886_v16 }
  0x36   :  { %430 = vmatpush.msrb.mxu2 %v757_v19  ;;  %390 = vmatpush.msrb.mxu0 %v693_v22  ;;  %v888_v19 = vld [vmem:[%s1174_s4] ss:$0 sm:$0xff] }
  0x37   :  { %450 = vmatpush.msrb.mxu3 %v789_v26  ;;  %410 = vmatpush.msrb.mxu1 %v725_v29 }
  0x38   :  { %431 = vmatpush.msrb.mxu2 %v756_v25  ;;  %391 = vmatpush.msrb.mxu0 %v692_v28 }
  0x39   :  { %451 = vmatpush.msrb.mxu3 %v788_v32  ;;  %411 = vmatpush.msrb.mxu1 %v724_v34 }
  0x3a   :  { %432 = vmatpush.msrb.mxu2 %v753_v31  ;;  %392 = vmatpush.msrb.mxu0 %v689_v33 }
  0x3b   :  { %452 = vmatpush.msrb.mxu3 %v785_v38  ;;  %358 = vmatmul.f32.vlgmr.msra.gmra.mxu2 %v288_v41 }
  0x3c   :  { %433 = vmatpush.msrb.mxu2 %v752_v37  ;;  %393 = vmatpush.msrb.mxu0 %v688_v39  ;;  %v815_v37 = vld [vmem:[%s1173_s3] sm:$0xff]  }
  0x3d   :  { %412 = vmatpush.msrb.mxu1 %v721_v42  ;;  %453 = vmatpush.msrb.mxu3 %v784_v44  ;;  %v817_v38 = vunpack.c.h.bf16 %v815_v37  ;;  %v816_v39 = vunpack.c.l.bf16 %v815_v37  ;;  %v890_v44 = vld [vmem:[%s1174_s4 + $0x2] ss:$0 sm:$0xff] }
  0x3e   :  { %434 = vmatpush.msrb.mxu2 %v749_v43  ;;  %318 = vmatmul.f32.vlgmr.msra.gmra.mxu0 %v286_v46 }
  0x3f   :  { %378 = vmatmul.f32.vlgmr.msra.gmra.mxu3 %v289_v49  ;;  %394 = vmatpush.msrb.mxu0 %v685_v47 }
  0x40   :  { %413 = vmatpush.msrb.mxu1 %v720_v50  ;;  %435 = vmatpush.msrb.mxu2 %v748_v51 }
  0x41   :  { %454 = vmatpush.msrb.mxu3 %v781_v53  ;;  %338 = vmatmul.f32.vlgmr.msra.gmra.mxu1 %v287_v55 }
  0x42   :  { %395 = vmatpush.msrb.mxu0 %v684_v56  ;;  %414 = vmatpush.msrb.mxu1 %v717_v57 }
  0x43   :  { %436 = vmatpush.msrb.mxu2 %v745_v59  ;;  %455 = vmatpush.msrb.mxu3 %v780_v60 }
  0x44   :  { %396 = vmatpush.msrb.mxu0 %v681_v61  ;;  %415 = vmatpush.msrb.mxu1 %v716_v62 }
  0x45   :  { %437 = vmatpush.msrb.mxu2 %v744_v0  ;;  %456 = vmatpush.msrb.mxu3 %v777_v1 }
  0x46   :  { %438 = vmatmul.f32.vlgmr.msrb.gmra.mxu2 %v292_v3  ;;  %397 = vmatpush.msrb.mxu0 %v680_v2 }
  0x47   :  { %416 = vmatpush.msrb.mxu1 %v713_v4  ;;  %457 = vmatpush.msrb.mxu3 %v776_v5 }
  0x48   :  { %398 = vmatmul.f32.vlgmr.msrb.gmra.mxu0 %v290_v6  ;;  %458 = vmatmul.f32.vlgmr.msrb.gmra.mxu3 %v293_v7 }
  0x49   :  { %417 = vmatpush.msrb.mxu1 %v712_v8  ;;  %489 = vmatpush.msra.mxu0 %v813_v11 }
  0x4a   :  { %418 = vmatmul.f32.vlgmr.msrb.gmra.mxu1 %v291_v9 }
  0x4b   :  { %490 = vmatpush.msra.mxu0 %v812_v12  ;;  %523 = vmatpush.msra.mxu1 %v821_v17 }
  0x4d   :  { %491 = vmatpush.msra.mxu0 %v809_v14  ;;  %524 = vmatpush.msra.mxu1 %v820_v18 }
  0x4f   :  { %492 = vmatpush.msra.mxu0 %v808_v15  ;;  %525 = vmatpush.msra.mxu1 %v817_v38 }
  0x51   :  { %526 = vmatpush.msra.mxu1 %v816_v39 }
  0xbb   :  { %v319_v20 = vpop.f32.mrf.mxu0 }
  0xbc   :  { %v320_v21 = vadd.f32 %v888_v19, %v319_v20 }
  0xbe   :  { %v339_v22 = vpop.f32.mrf.mxu1  ;;  %v359_v24 = vpop.f32.mrf.mxu2 }
  0xbf   :  { %v340_v23 = vadd.f32 %v339_v22, %v320_v21 }
  0xc1   :  { %v360_v25 = vadd.f32 %v359_v24, %v340_v23 }
  0xc2   :  { %v379_v26 = vpop.f32.mrf.mxu3 }
  0xc3   :  { %v380_v27 = vadd.f32 %v379_v26, %v360_v25 }
  0xc5   :  { %v399_v28 = vpop.f32.mrf.mxu0 }
  0xc6   :  { %v400_v29 = vadd.f32 %v399_v28, %v380_v27 }
  0xc7   :  { %v419_v30 = vpop.f32.mrf.mxu1 }
  0xc8   :  { %v420_v31 = vadd.f32 %v419_v30, %v400_v29 }
  0xc9   :  { %v439_v32 = vpop.f32.mrf.mxu2 }
  0xca   :  { %v440_v33 = vadd.f32 %v439_v32, %v420_v31 }
  0xcb   :  { %v459_v34 = vpop.f32.mrf.mxu3 }
  0xcc   :  { %v460_v35 = vadd.f32 %v459_v34, %v440_v33 }
  0xce   :  { %v462_v36 = vmax.f32 %v460_v35, 0.0 }
  0xd0   :  { %548 = vmatmul.msk.f32.vlgmr.msra.gmra.mxu0 %vm473_vm0, %v462_v36 }
 0x14d   :  { %v494_v41 = vpop.f32.mrf.mxu0 }
 0x14e   :  { %v495_v42 = vadd.f32 %v889_v40, %v494_v41 }
 0x150   :  { %v497_v43 = vmax.f32 %v495_v42, 0.0 }
 0x152   :  { %549 = vmatmul.msk.f32.vlgmr.msra.gmra.mxu1 %vm473_vm0, %v497_v43 }
 0x1cf   :  { %v528_v45 = vpop.f32.mrf.mxu1 }
 0x1d0   :  { %v529_v46 = vadd.f32 %v890_v44, %v528_v45 }
 0x1d2   :  { %531 = vst [vmem:[#allocation2] sm:$0x3] %v529_v46 }
 0x1d3   :  { %542 = dma.vmem_to_hbm [thread:$0]  %s538_s10, 32, %s540_s12, [#allocation3]  }
 0x1d4   :  { %915 = dma.done.wait [#allocation3], 32  }
 0x1d5   :  { %916 = vsyncadd [#allocation3], 4294967264 }
 0x1d6   :  { %547 = vsyncpa [#allocation3], 1 }

</bundles_post_ra>
